<compile_context>
chip_gen: v7x
topology: tpu7x:2x2x1
jax: 0.10.0
libtpu: 0.0.40
codegen_flags: <defaults>
</compile_context>

<pallas_src>
import numpy as np
import jax
import jax.numpy as jnp
from jax import lax
from jax.experimental import pallas as pl
from jax.experimental.pallas import tpu as pltpu


def _build_idft_weight(input_size: int) -> np.ndarray:
    """Deterministic (N, N) weight, exactly as the PyTorch __init__ builds it.

    The effective conv matrix is [w | w] (shape (N, 2N)); we return only w and
    exploit the duplication inside the kernel (out = w @ (x_top + x_bot)).
    """
    F = np.conj(np.fft.ifft(np.eye(input_size)))                  # (N, N) complex128
    w = F.imag.astype(np.float32) + F.real.astype(np.float32)     # (N, N) float32
    return w


def _idft_kernel(w_ref, x_ref, o_ref):
    # w_ref: (N, N)        VMEM-resident weight (constant index_map)
    # x_ref: (Bt, 2N, T)   activation tile in native NCHW-flattened layout
    # o_ref: (Bt, N, T)    lane-dense output tile
    n = w_ref.shape[0]
    bt, _, t = x_ref.shape
    w = w_ref[...]

    # Chunk the spatial (lane) dim so vreg live ranges stay bounded even when
    # the DMA tile is tens of thousands of columns wide.
    if t % 512 == 0:
        chunk = 512
    elif t % 256 == 0:
        chunk = 256
    elif t % 128 == 0:
        chunk = 128
    else:
        chunk = t
    n_chunks = t // chunk

    for b in range(bt):  # static, small (batch rows blocked per step)
        def chunk_body(c, carry):
            start = pl.multiple_of(c * chunk, chunk)
            x = x_ref[b, :, pl.ds(start, chunk)]            # (2N, chunk)
            xs = x[:n, :] + x[n:, :]                          # fold duplicated [w|w] halves (VPU)
            o_ref[b, :, pl.ds(start, chunk)] = jnp.dot(
                w, xs, preferred_element_type=jnp.float32)
            return carry
        lax.fori_loop(0, n_chunks, chunk_body, 0, unroll=True)


def idft_layer_forward(x_nchw: jax.Array, weight_nn: jax.Array, *,
                       target_step_bytes: int = 2 << 20):
    """x_nchw: (B, 2N, H, W) float32; weight_nn: (N, N) float32 -> (B, N, H, W)."""
    B, Cin, H, W = x_nchw.shape
    N = weight_nn.shape[0]
    assert weight_nn.shape == (N, N)
    assert Cin == 2 * N, "IDFTLayer forward expects 2N input channels"

    HW = H * W
    x_flat = x_nchw.reshape(B, Cin, HW)  # free view, no data movement

    # HBM bytes moved per spatial column per batch row (f32 in + out).
    bytes_per_col = (Cin + N) * 4
    target_cols = max(128, target_step_bytes // bytes_per_col)

    if HW <= target_cols:
        # Whole spatial extent per step (block dim == full array dim, so no
        # 128-divisibility requirement). Block batch rows to reach the traffic
        # target; for tiny problems this collapses to a single grid step.
        t_hw = HW
        want_bt = max(1, min(B, target_cols // max(HW, 1)))
        bt = 1
        for d in range(want_bt, 0, -1):          # largest divisor of B <= want_bt
            if B % d == 0:
                bt = d
                break
    else:
        bt = 1
        t_hw = min((target_cols // 512) * 512, (HW // 128) * 128)
        t_hw = max(t_hw, 128)
        # v7x megacore: if the batch axis can't give a 2-way split, prefer an
        # even spatial grid extent so neither TensorCore sits idle.
        if B % 2 == 1:
            while t_hw > 128 and pl.cdiv(HW, t_hw) % 2 == 1:
                t_hw -= 128

    grid_b = pl.cdiv(B, bt)                      # bt always divides B
    grid_s = pl.cdiv(HW, t_hw)                   # partial tail block -> masked stores, no pad

    cp_kwargs = dict(dimension_semantics=("parallel", "parallel"))
    est_vmem = 4 * (2 * N * N + 2 * bt * Cin * t_hw + 2 * bt * N * t_hw)
    if est_vmem > (12 << 20):                    # only if a caller asks for very large steps
        cp_kwargs["vmem_limit_bytes"] = min(est_vmem + (4 << 20), 48 << 20)

    out_flat = pl.pallas_call(
        _idft_kernel,
        out_shape=jax.ShapeDtypeStruct((B, N, HW), jnp.float32),
        grid_spec=pltpu.PrefetchScalarGridSpec(
            num_scalar_prefetch=0,
            grid=(grid_b, grid_s),
            in_specs=[
                pl.BlockSpec((N, N), lambda b, j: (0, 0)),            # weight, VMEM-resident
                pl.BlockSpec((bt, Cin, t_hw), lambda b, j: (b, 0, j)),
            ],
            out_specs=pl.BlockSpec((bt, N, t_hw), lambda b, j: (b, 0, j)),
        ),
        compiler_params=pltpu.CompilerParams(**cp_kwargs),
    )(weight_nn, x_flat)

    return out_flat.reshape(B, N, H, W)          # free view back to NCHW


if __name__ == "__main__":
    input_size = 8                     # N
    B, H, W = 2, 16, 16
    Cin = 2 * input_size               # conv weight (as assigned) expects 2N in-channels

    key = jax.random.PRNGKey(0)
    x = jax.random.normal(key, (B, Cin, H, W), dtype=jnp.float32)

    w_nn = jnp.asarray(_build_idft_weight(input_size))            # (N, N)

    out = idft_layer_forward(x, w_nn)
    out = jax.block_until_ready(out)

    # Reference: the exact effective 1x1 conv with the full [w | w] weight.
    combined = jnp.concatenate([w_nn, w_nn], axis=1)              # (N, 2N)
    ref = jnp.einsum("oc,bchw->bohw", combined, x)
    assert out.shape == (B, input_size, H, W)
    assert jnp.allclose(out, ref, atol=1e-5, rtol=1e-5)

    print("KERNEL_OK")
</pallas_src>

<mosaic_0001>
module attributes {stable_mosaic.version = 11 : i64} {
  func.func @_idft_kernel(%arg0: i32, %arg1: i32, %arg2: memref<8x8xf32, #tpu.memory_space<vmem>>, %arg3: memref<2x16x256xf32, #tpu.memory_space<vmem>>, %arg4: memref<2x8x256xf32, #tpu.memory_space<vmem>>) attributes {dimension_semantics = [#tpu.dimension_semantics<parallel>, #tpu.dimension_semantics<parallel>], iteration_bounds = array<i64: 1, 1>, scalar_prefetch = 0 : i64, scratch_operands = 0 : i64, tpu.core_type = #tpu.core_type<tc>, window_params = [{pipeline_mode = #tpu.pipeline_mode<synchronous>, transform_indices = @transform_0, window_bounds = array<i64: 8, 8>}, {transform_indices = @transform_1, window_bounds = array<i64: 2, 16, 256>}, {transform_indices = @transform_2, window_bounds = array<i64: 2, 8, 256>}]} {
    %c0 = arith.constant 0 : index
    %c0_0 = arith.constant 0 : index
    %0 = vector.load %arg2[%c0, %c0_0] : memref<8x8xf32, #tpu.memory_space<vmem>>, vector<8x8xf32>
    %c0_i32 = arith.constant 0 : i32
    %c256_i32 = arith.constant 256 : i32
    %1 = arith.muli %c0_i32, %c256_i32 : i32
    %2 = tpu.assume_multiple %1, 256 : i32
    %c0_1 = arith.constant 0 : index
    %c0_2 = arith.constant 0 : index
    %3 = arith.index_cast %2 : i32 to index
    %4 = vector.load %arg3[%c0_1, %c0_2, %3] : memref<2x16x256xf32, #tpu.memory_space<vmem>>, vector<1x16x256xf32>
    %5 = vector.shape_cast %4 : vector<1x16x256xf32> to vector<16x256xf32>
    %6 = vector.extract_strided_slice %5 {offsets = [0, 0], sizes = [8, 256], strides = [1, 1]} : vector<16x256xf32> to vector<8x256xf32>
    %7 = vector.extract_strided_slice %5 {offsets = [8, 0], sizes = [8, 256], strides = [1, 1]} : vector<16x256xf32> to vector<8x256xf32>
    %8 = arith.addf %6, %7 : vector<8x256xf32>
    %cst = arith.constant dense<0.000000e+00> : vector<8x256xf32>
    %9 = tpu.matmul %0, %8, %cst {dimension_numbers = #tpu.dot_dimension_numbers<[1], [0], [0], [1], [0, 0, 1, 1], [], []>} : vector<8x8xf32>, vector<8x256xf32>, vector<8x256xf32> -> vector<8x256xf32>
    %c0_3 = arith.constant 0 : index
    %c0_4 = arith.constant 0 : index
    %10 = arith.index_cast %2 : i32 to index
    %11 = vector.load %arg4[%c0_3, %c0_4, %10] : memref<2x8x256xf32, #tpu.memory_space<vmem>>, vector<1x8x256xf32>
    %12 = vector.shape_cast %11 : vector<1x8x256xf32> to vector<8x256xf32>
    %13 = vector.shape_cast %9 : vector<8x256xf32> to vector<1x8x256xf32>
    tpu.vector_store %arg4[%c0_3, %c0_4, %10], %13 {strides = array<i32>} : memref<2x8x256xf32, #tpu.memory_space<vmem>>, vector<1x8x256xf32>,
    %c1_i32 = arith.constant 1 : i32
    %c0_i32_5 = arith.constant 0 : i32
    %c256_i32_6 = arith.constant 256 : i32
    %14 = arith.muli %c0_i32_5, %c256_i32_6 : i32
    %15 = tpu.assume_multiple %14, 256 : i32
    %c1 = arith.constant 1 : index
    %c0_7 = arith.constant 0 : index
    %16 = arith.index_cast %15 : i32 to index
    %17 = vector.load %arg3[%c1, %c0_7, %16] : memref<2x16x256xf32, #tpu.memory_space<vmem>>, vector<1x16x256xf32>
    %18 = vector.shape_cast %17 : vector<1x16x256xf32> to vector<16x256xf32>
    %19 = vector.extract_strided_slice %18 {offsets = [0, 0], sizes = [8, 256], strides = [1, 1]} : vector<16x256xf32> to vector<8x256xf32>
    %20 = vector.extract_strided_slice %18 {offsets = [8, 0], sizes = [8, 256], strides = [1, 1]} : vector<16x256xf32> to vector<8x256xf32>
    %21 = arith.addf %19, %20 : vector<8x256xf32>
    %cst_8 = arith.constant dense<0.000000e+00> : vector<8x256xf32>
    %22 = tpu.matmul %0, %21, %cst_8 {dimension_numbers = #tpu.dot_dimension_numbers<[1], [0], [0], [1], [0, 0, 1, 1], [], []>} : vector<8x8xf32>, vector<8x256xf32>, vector<8x256xf32> -> vector<8x256xf32>
    %c1_9 = arith.constant 1 : index
    %c0_10 = arith.constant 0 : index
    %23 = arith.index_cast %15 : i32 to index
    %24 = vector.load %arg4[%c1_9, %c0_10, %23] : memref<2x8x256xf32, #tpu.memory_space<vmem>>, vector<1x8x256xf32>
    %25 = vector.shape_cast %24 : vector<1x8x256xf32> to vector<8x256xf32>
    %26 = vector.shape_cast %22 : vector<8x256xf32> to vector<1x8x256xf32>
    tpu.vector_store %arg4[%c1_9, %c0_10, %23], %26 {strides = array<i32>} : memref<2x8x256xf32, #tpu.memory_space<vmem>>, vector<1x8x256xf32>,
    %c1_i32_11 = arith.constant 1 : i32
    return
  }
  func.func @transform_0(%arg0: i32, %arg1: i32) -> (i32, i32) {
    %c0_i32 = arith.constant 0 : i32
    %c0_i32_0 = arith.constant 0 : i32
    %c0_i32_1 = arith.constant 0 : i32
    return %c0_i32, %c0_i32_0 : i32, i32
  }
  func.func @transform_1(%arg0: i32, %arg1: i32) -> (i32, i32, i32) {
    %c0_i32 = arith.constant 0 : i32
    %c0_i32_0 = arith.constant 0 : i32
    return %arg0, %c0_i32, %arg1 : i32, i32, i32
  }
  func.func @transform_2(%arg0: i32, %arg1: i32) -> (i32, i32, i32) {
    %c0_i32 = arith.constant 0 : i32
    %c0_i32_0 = arith.constant 0 : i32
    return %arg0, %c0_i32, %arg1 : i32, i32, i32
  }
}

</mosaic_0001>

<bundles_post_ra>
// kernel: tpu_custom_call.1
= control target key start
LH: loop header
LB: loop body
LE: loop exit
PB: predicated region body
PF: predicated region fallthrough
CT: control target
= control target key end

     0   :  { %7 = vsyncpa [#allocation3], 0  ;;  %s377_s0 = inlined_call_operand.hbm [shape: f32[8,8], index: 0, kind: input, shape index: {}]   ;;  %s378_s1 = inlined_call_operand.hbm [shape: f32[2,16,256], index: 1, kind: input, shape index: {}]   ;;  %s379_s2 = inlined_call_operand.hbm [shape: f32[2,8,256], index: 2, kind: output, shape index: {}]  }
   0x1   :  { %8 = vsyncpa [#allocation6], 0 }
   0x2   :  { %9 = vsyncpa [#allocation4], 0  ;;  %s307_s9 = smov [#allocation2]   ;;  %s308_s11 = smov [#allocation5]  }
   0x3   :  { %s16_s10 = sshll.u32 %s307_s9, 4  ;;  %s25_s12 = sshll.u32 %s308_s11, 4  ;;  %s17_s10 = int_to_ptr.vmem [resolvable:$true] %s16_s10  ;;  %s328_s12 = int_to_ptr.vmem [resolvable:$true] %s25_s12 }
   0x4   :  { %s235_s15 = scalar_lea.hbm %s377_s0, 128 }
   0x5   :  { %p236_p0 = scmp.ne.s32.totalorder %s377_s0, %s235_s15  ;;  %p239_p1 = scmp.lt.u32.totalorder %s235_s15, %s377_s0 }
   0x7   :  { %p241_p2 = pnand %p239_p1, %p236_p0 }
   0x9   :  { %244 = shalt.err (!%p241_p2)
}
   0xa   :  { %s245_s20 = scalar_lea.vmem %s17_s10, 128  ;;  %p250_p4 = scmp.lt.s32.totalorder %s17_s10, %s17_s10 }
   0xb   :  { %p246_p3 = scmp.ne.s32.totalorder %s17_s10, %s245_s20  ;;  %p251_p5 = scmp.lt.s32.totalorder %s245_s20, %s245_s20 }
   0xd   :  { %p252_p6 = por %p251_p5, %p250_p4 }
   0xf   :  { %p253_p7 = pnand %p252_p6, %p246_p3 }
  0x11   :  { %256 = shalt.err (!%p253_p7)
}
  0x12   :  { %19 = dma.hbm_to_vmem [thread:$0]  %s377_s0, 128, %s17_s10, [#allocation3]  }
  0x13   :  { %s257_s25 = scalar_lea.hbm %s378_s1, 1024 }
  0x14   :  { %p258_p8 = scmp.ne.s32.totalorder %s378_s1, %s257_s25  ;;  %p261_p9 = scmp.lt.u32.totalorder %s257_s25, %s378_s1 }
  0x16   :  { %p263_p10 = pnand %p261_p9, %p258_p8 }
  0x18   :  { %266 = shalt.err (!%p263_p10)
}
  0x19   :  { %s267_s30 = scalar_lea.vmem %s328_s12, 1024  ;;  %p272_p12 = scmp.lt.s32.totalorder %s328_s12, %s328_s12 }
  0x1a   :  { %p268_p11 = scmp.ne.s32.totalorder %s328_s12, %s267_s30  ;;  %p273_p13 = scmp.lt.s32.totalorder %s267_s30, %s267_s30 }
  0x1c   :  { %p274_p0 = por %p273_p13, %p272_p12 }
  0x1e   :  { %p275_p1 = pnand %p274_p0, %p268_p11 }
  0x20   :  { %278 = shalt.err (!%p275_p1)
}
  0x21   :  { %s309_s0 = smov 256   ;;  %s310_s3 = smov 16  }
  0x22   :  { %31 = dma.hbm_to_vmem [thread:$0]  %s378_s1, 1024, %s328_s12, [#allocation6], %s309_s0, %s309_s0, %s310_s3  }
  0x23   :  { %301 = dma.done.wait [#allocation3], 128  }
  0x24   :  { %302 = vsyncadd [#allocation3], 4294967168 }
  0x25   :  { %303 = dma.done.wait [#allocation6], 1024  }
  0x26   :  { %304 = vsyncadd [#allocation6], 4294966272  ;;  %v311_v0 = vmov 0.0   ;;  %v40_v1 = vld [vmem:[#allocation5 + $0x8] sm:$0xff]  ;;  %v42_v2 = vld [vmem:[#allocation5 + $0x18] sm:$0xff]  ;;  %vm45_vm0 = vcmask 64512  }
  0x27   :  { %113 = vmatprep.mubr.f32.mxu0 %v311_v0  ;;  %195 = vmatprep.mubr.f32.mxu1 %v311_v0  ;;  %v126_v3 = vld [vmem:[#allocation5 + $0x28] sm:$0xff]  ;;  %v44_v4 = vadd.f32 %v42_v2, %v40_v1  ;;  %v128_v5 = vld [vmem:[#allocation5 + $0x38] sm:$0xff]  ;;  %v39_v6 = vld [vmem:[#allocation5] sm:$0xff]  ;;  %s312_s1 = smov [#allocation7]  }
  0x28   :  { %v41_v7 = vld [vmem:[#allocation5 + $0x10] sm:$0xff]  ;;  %v130_v8 = vadd.f32 %v128_v5, %v126_v3  ;;  %v125_v10 = vld [vmem:[#allocation5 + $0x20] sm:$0xff]  ;;  %v38_v12 = vld [vmem:[#allocation2] sm:$0xff]  ;;  %s212_s6 = sshll.u32 %s312_s1, 4  ;;  %s213_s6 = int_to_ptr.vmem [resolvable:$true] %s212_s6 }
  0x29   :  { %v43_v9 = vadd.f32 %v41_v7, %v39_v6  ;;  %v127_v11 = vld [vmem:[#allocation5 + $0x30] sm:$0xff]  ;;  %49 = vmatprep.subr.mxu0 %v44_v4  ;;  %s279_s7 = scalar_lea.vmem %s213_s6, 512  ;;  %p284_p3 = scmp.lt.s32.totalorder %s213_s6, %s213_s6 }
  0x2a   :  { %v129_v13 = vadd.f32 %v127_v11, %v125_v10  ;;  %131 = vmatprep.subr.mxu1 %v130_v8  ;;  %p280_p2 = scmp.ne.s32.totalorder %s213_s6, %s279_s7  ;;  %p285_p4 = scmp.lt.s32.totalorder %s279_s7, %s279_s7 }
  0x2b   :  { %50 = vmatpush1.msra.mxu0 %v43_v9 }
  0x2c   :  { %132 = vmatpush1.msra.mxu1 %v129_v13  ;;  %227 = vmatmul.mubr.msk.f32.vlgmr.msra.gmra.mrb[0].mxu0 %vm45_vm0, %v38_v12  ;;  %p286_p5 = por %p285_p4, %p284_p3 }
  0x2d   :  { %228 = vmatmul.mubr.msk.f32.vlgmr.msra.gmra.mrb[0].mxu1 %vm45_vm0, %v38_v12 }
  0x2e   :  { %p287_p6 = pnand %p286_p5, %p280_p2 }
  0xff   :  { %v115_v14 = vpop.f32.mrb[0].mxu0 }
 0x100   :  { %120 = vst [vmem:[#allocation7] sm:$0xff] %v115_v14  ;;  %v197_v15 = vpop.f32.mrb[0].mxu1  ;;  %v117_v16 = vpop.f32.mrb[1].mxu0 }
 0x101   :  { %205 = vst [vmem:[#allocation7 + $0x10] sm:$0xff] %v197_v15  ;;  %121 = vst [vmem:[#allocation7 + $0x8] sm:$0xff] %v117_v16  ;;  %v199_v17 = vpop.f32.mrb[1].mxu1 }
 0x102   :  { %206 = vst [vmem:[#allocation7 + $0x18] sm:$0xff] %v199_v17 }
 0x103   :  { %290 = shalt.err (!%p287_p6)
}
 0x104   :  { %s291_s10 = scalar_lea.hbm %s379_s2, 512 }
 0x105   :  { %p292_p7 = scmp.ne.s32.totalorder %s379_s2, %s291_s10  ;;  %p295_p8 = scmp.lt.u32.totalorder %s291_s10, %s379_s2 }
 0x107   :  { %p297_p9 = pnand %p295_p8, %p292_p7 }
 0x109   :  { %300 = shalt.err (!%p297_p9)
}
 0x10a   :  { %218 = dma.vmem_to_hbm [thread:$0]  %s213_s6, 512, %s379_s2, [#allocation4], %s309_s0, %s309_s0, %s310_s3  }
 0x10b   :  { %305 = dma.done.wait [#allocation4], 512  }
 0x10c   :  { %306 = vsyncadd [#allocation4], 4294966784 }
 0x10d   :  { %222 = vsyncpa [#allocation3], 1 }
 0x10e   :  { %223 = vsyncpa [#allocation6], 1 }
 0x10f   :  { %224 = vsyncpa [#allocation4], 1 }

</bundles_post_ra>
